<compile_context>
chip_gen: v6e
topology: v6e:2x2x1
jax: 0.10.0
libtpu: 0.0.40
codegen_flags: <defaults>
</compile_context>

<pallas_src>
import jax
import jax.numpy as jnp
from jax.experimental import pallas as pl
from jax.experimental.pallas import tpu as pltpu


def _disc_kernel(x_ref, w1_ref, b1_ref, w2_ref, b2_ref, o_ref):
    # ---- Layer 1 on the MXU (bf16 operands, f32 accumulation) ----
    h = jnp.dot(x_ref[...], w1_ref[...],
                preferred_element_type=jnp.float32) + b1_ref[...]      # (TB, H) f32
    # LeakyReLU(0.2) in f32 on the VPU (v5e has no bf16 VPU, so keep f32).
    h = jnp.where(h > 0, h, 0.2 * h)

    # ---- Layer 2: contract H of (8, H) padded w2 with H of (TB, H) h ----
    # Row 0 of w2_ref is the real weight row; rows 1..7 are zero padding so the
    # matmul output tile is (8, TB).  The result is already lane-dense
    # (batch on the lane axis), so the final store is an unmasked vst.
    z_all = jax.lax.dot_general(
        w2_ref[...], h, (((1,), (1,)), ((), ())),
        preferred_element_type=jnp.float32)                            # (8, TB) f32
    z = z_all[0:1, :] + b2_ref[0, 0]                                   # (1, TB), SMEM scalar bias

    # Sigmoid: exp and approx reciprocal both land on the EUP slot.
    o_ref[...] = pl.reciprocal(1.0 + jnp.exp(-z), approx=True)


def discriminator_forward(x, w1, b1, w2, b2, *, block_b=512, use_bf16=True):
    """x: (B, D) f32; w1: (D, H); b1: (1, H); w2: (H, 1); b2: (1, 1).

    Returns (B, 1) f32, matching nn.Sequential(Linear, LeakyReLU(0.2), Linear, Sigmoid).
    """
    B, D = x.shape
    H = w1.shape[1]

    # Batch tile: multiple of 8; when it is a strict sub-tile of the padded
    # batch it must also be a multiple of 128 so the lane-dense output block is
    # legal.  512 rows keeps the pipeline near the HBM roofline while staying
    # far below v7x's 64 MiB VMEM even for large D.
    if B >= block_b:
        assert block_b % 128 == 0, "block_b must be a multiple of 128"
        TB = block_b
    else:
        TB = max(8, ((B + 7) // 8) * 8)        # whole (padded) batch in one tile
    B_pad = ((B + TB - 1) // TB) * TB
    G = B_pad // TB
    if B_pad != B:
        x = jnp.pad(x, ((0, B_pad - B), (0, 0)))

    in_dtype = jnp.bfloat16 if use_bf16 else jnp.float32
    x_in = x.astype(in_dtype)
    w1_in = w1.astype(in_dtype)
    b1_in = b1.astype(jnp.float32)
    # w2 (H, 1) -> (1, H) row, zero-padded to 8 rows for a clean MXU tile.
    w2_pad = jnp.pad(w2.astype(jnp.float32).reshape(1, H), ((0, 7), (0, 0)))
    b2_in = b2.astype(jnp.float32).reshape(1, 1)

    itemsize = jnp.dtype(in_dtype).itemsize
    cost = pl.CostEstimate(
        flops=2 * B_pad * D * H + 2 * B_pad * H,
        transcendentals=B_pad,
        bytes_accessed=(B_pad * D * itemsize          # x
                        + D * H * itemsize            # w1
                        + H * 4 + 8 * H * 4 + 4       # b1, w2, b2
                        + B_pad * 4),                 # output
    )

    out = pl.pallas_call(
        _disc_kernel,
        out_shape=jax.ShapeDtypeStruct((1, B_pad), jnp.float32),
        grid=(G,),
        in_specs=[
            pl.BlockSpec((TB, D), lambda i: (i, 0)),                 # x: tiled over batch
            pl.BlockSpec((D, H), lambda i: (0, 0)),                  # w1: resident
            pl.BlockSpec((1, H), lambda i: (0, 0)),                  # b1: resident
            pl.BlockSpec((8, H), lambda i: (0, 0)),                  # w2 (padded row): resident
            pl.BlockSpec(memory_space=pltpu.MemorySpace.SMEM),       # b2: scalar in SMEM
        ],
        out_specs=pl.BlockSpec((1, TB), lambda i: (0, i)),           # lane-dense output
        compiler_params=pltpu.CompilerParams(
            dimension_semantics=("parallel",),        # shard batch axis across TCs (v7x)
            vmem_limit_bytes=32 * 1024 * 1024,        # safe under v7x's 64 MiB physical VMEM
        ),
        cost_estimate=cost,
    )(x_in, w1_in, b1_in, w2_pad, b2_in)

    return out[0, :B].reshape(B, 1)


def init_params(key, input_size):
    """Deterministic init mimicking PyTorch Linear default (uniform +-1/sqrt(fan_in))."""
    hidden = input_size // 4
    k1, k2, k3, k4 = jax.random.split(key, 4)
    bound1 = 1.0 / jnp.sqrt(input_size)
    bound2 = 1.0 / jnp.sqrt(hidden)
    # stored already transposed: (in, out)
    w1 = jax.random.uniform(k1, (input_size, hidden), jnp.float32, -bound1, bound1)
    b1 = jax.random.uniform(k2, (1, hidden), jnp.float32, -bound1, bound1)
    w2 = jax.random.uniform(k3, (hidden, 1), jnp.float32, -bound2, bound2)
    b2 = jax.random.uniform(k4, (1, 1), jnp.float32, -bound2, bound2)
    return w1, b1, w2, b2


if __name__ == "__main__":
    key = jax.random.PRNGKey(0)
    batch, input_size = 256, 64            # hidden = input_size // 4 = 16
    kx, kp = jax.random.split(key)
    x = jax.random.normal(kx, (batch, input_size), jnp.float32)
    w1, b1, w2, b2 = init_params(kp, input_size)

    # block_b=128 -> 2 grid steps: exercises the batch-tiled pipeline.
    out = discriminator_forward(x, w1, b1, w2, b2, block_b=128)
    jax.block_until_ready(out)

    # Reference in plain JAX (f32).  Kernel uses bf16 MXU operands + approx
    # reciprocal, so compare with a correspondingly loose tolerance.
    h = x @ w1 + b1
    h = jnp.where(h > 0, h, 0.2 * h)
    ref = jax.nn.sigmoid(h @ w2 + b2)
    assert out.shape == (batch, 1)
    assert jnp.allclose(out, ref, atol=2e-2), "mismatch vs reference"

    print("KERNEL_OK")
</pallas_src>

<mosaic_0001>
module attributes {stable_mosaic.version = 11 : i64} {
  func.func @_disc_kernel(%arg0: i32, %arg1: memref<128x64xbf16, #tpu.memory_space<vmem>>, %arg2: memref<64x16xbf16, #tpu.memory_space<vmem>>, %arg3: memref<1x16xf32, #tpu.memory_space<vmem>>, %arg4: memref<8x16xf32, #tpu.memory_space<vmem>>, %arg5: memref<1x1xf32, #tpu.memory_space<smem>>, %arg6: memref<1x128xf32, #tpu.memory_space<vmem>>) attributes {dimension_semantics = [#tpu.dimension_semantics<parallel>], iteration_bounds = array<i64: 2>, scalar_prefetch = 0 : i64, scratch_operands = 0 : i64, tpu.core_type = #tpu.core_type<tc>, window_params = [{transform_indices = @transform_0, window_bounds = array<i64: 128, 64>}, {pipeline_mode = #tpu.pipeline_mode<synchronous>, transform_indices = @transform_1, window_bounds = array<i64: 64, 16>}, {pipeline_mode = #tpu.pipeline_mode<synchronous>, transform_indices = @transform_2, window_bounds = array<i64: 1, 16>}, {pipeline_mode = #tpu.pipeline_mode<synchronous>, transform_indices = @transform_3, window_bounds = array<i64: 8, 16>}, {transform_indices = @transform_4, window_bounds = array<i64: 1, 1>}, {transform_indices = @transform_5, window_bounds = array<i64: 1, 128>}]} {
    %c0 = arith.constant 0 : index
    %c0_0 = arith.constant 0 : index
    %0 = vector.load %arg1[%c0, %c0_0] : memref<128x64xbf16, #tpu.memory_space<vmem>>, vector<128x64xbf16>
    %c0_1 = arith.constant 0 : index
    %c0_2 = arith.constant 0 : index
    %1 = vector.load %arg2[%c0_1, %c0_2] : memref<64x16xbf16, #tpu.memory_space<vmem>>, vector<64x16xbf16>
    %cst = arith.constant dense<0.000000e+00> : vector<128x16xf32>
    %2 = tpu.matmul %0, %1, %cst {dimension_numbers = #tpu.dot_dimension_numbers<[1], [0], [0], [1], [0, 0, 1, 1], [], []>} : vector<128x64xbf16>, vector<64x16xbf16>, vector<128x16xf32> -> vector<128x16xf32>
    %c0_3 = arith.constant 0 : index
    %c0_4 = arith.constant 0 : index
    %3 = vector.load %arg3[%c0_3, %c0_4] : memref<1x16xf32, #tpu.memory_space<vmem>>, vector<1x16xf32>
    %4 = vector.broadcast %3 : vector<1x16xf32> to vector<128x16xf32>
    %5 = arith.addf %2, %4 : vector<128x16xf32>
    %cst_5 = arith.constant 0.000000e+00 : f32
    %6 = vector.broadcast %cst_5 : f32 to vector<128x16xf32>
    %7 = arith.cmpf ogt, %5, %6 : vector<128x16xf32>
    %cst_6 = arith.constant 2.000000e-01 : f32
    %8 = vector.broadcast %cst_6 : f32 to vector<128x16xf32>
    %9 = arith.mulf %8, %5 : vector<128x16xf32>
    %10 = arith.select %7, %5, %9 : vector<128x16xi1>, vector<128x16xf32>
    %c0_7 = arith.constant 0 : index
    %c0_8 = arith.constant 0 : index
    %11 = vector.load %arg4[%c0_7, %c0_8] : memref<8x16xf32, #tpu.memory_space<vmem>>, vector<8x16xf32>
    %cst_9 = arith.constant dense<0.000000e+00> : vector<8x128xf32>
    %12 = tpu.matmul %11, %10, %cst_9 {dimension_numbers = #tpu.dot_dimension_numbers<[1], [1], [0], [0], [0, 0, 1, 0], [], []>} : vector<8x16xf32>, vector<128x16xf32>, vector<8x128xf32> -> vector<8x128xf32>
    %13 = vector.extract_strided_slice %12 {offsets = [0, 0], sizes = [1, 128], strides = [1, 1]} : vector<8x128xf32> to vector<1x128xf32>
    %c0_10 = arith.constant 0 : index
    %c0_11 = arith.constant 0 : index
    %14 = memref.load %arg5[%c0_10, %c0_11] : memref<1x1xf32, #tpu.memory_space<smem>>
    %15 = vector.broadcast %14 : f32 to vector<1x128xf32>
    %16 = arith.addf %13, %15 : vector<1x128xf32>
    %cst_12 = arith.constant 0.000000e+00 : f32
    %17 = vector.broadcast %cst_12 : f32 to vector<1x128xf32>
    %18 = arith.subf %17, %16 : vector<1x128xf32>
    %19 = math.exp %18 : vector<1x128xf32>
    %cst_13 = arith.constant 1.000000e+00 : f32
    %20 = vector.broadcast %cst_13 : f32 to vector<1x128xf32>
    %21 = arith.addf %20, %19 : vector<1x128xf32>
    %22 = tpu.reciprocal %21 {approx = true} : vector<1x128xf32> -> vector<1x128xf32>
    %c0_14 = arith.constant 0 : index
    %c0_15 = arith.constant 0 : index
    %23 = vector.load %arg6[%c0_14, %c0_15] : memref<1x128xf32, #tpu.memory_space<vmem>>, vector<1x128xf32>
    tpu.vector_store %arg6[%c0_14, %c0_15], %22 {strides = array<i32>} : memref<1x128xf32, #tpu.memory_space<vmem>>, vector<1x128xf32>,
    return
  }
  func.func @transform_0(%arg0: i32) -> (i32, i32) {
    %c0_i32 = arith.constant 0 : i32
    %c0_i32_0 = arith.constant 0 : i32
    return %arg0, %c0_i32 : i32, i32
  }
  func.func @transform_1(%arg0: i32) -> (i32, i32) {
    %c0_i32 = arith.constant 0 : i32
    %c0_i32_0 = arith.constant 0 : i32
    %c0_i32_1 = arith.constant 0 : i32
    return %c0_i32, %c0_i32_0 : i32, i32
  }
  func.func @transform_2(%arg0: i32) -> (i32, i32) {
    %c0_i32 = arith.constant 0 : i32
    %c0_i32_0 = arith.constant 0 : i32
    %c0_i32_1 = arith.constant 0 : i32
    return %c0_i32, %c0_i32_0 : i32, i32
  }
  func.func @transform_3(%arg0: i32) -> (i32, i32) {
    %c0_i32 = arith.constant 0 : i32
    %c0_i32_0 = arith.constant 0 : i32
    %c0_i32_1 = arith.constant 0 : i32
    return %c0_i32, %c0_i32_0 : i32, i32
  }
  func.func @transform_4(%arg0: i32) -> (i32, i32) {
    %c0_i32 = arith.constant 0 : i32
    %c0_i32_0 = arith.constant 0 : i32
    %c0_i32_1 = arith.constant 0 : i32
    return %c0_i32, %c0_i32_0 : i32, i32
  }
  func.func @transform_5(%arg0: i32) -> (i32, i32) {
    %c0_i32 = arith.constant 0 : i32
    %c0_i32_0 = arith.constant 0 : i32
    return %c0_i32, %arg0 : i32, i32
  }
}

</mosaic_0001>

<bundles_post_ra>
// kernel: tpu_custom_call.1
= control target key start
LH: loop header
LB: loop body
LE: loop exit
PB: predicated region body
PF: predicated region fallthrough
CT: control target
= control target key end

     0   :  { %s1169_s0 = inlined_call_operand.vmem [shape: bf16[256,64], index: 0, kind: input, shape index: {}]   ;;  %s1170_s1 = inlined_call_operand.vmem [shape: bf16[64,16], index: 1, kind: input, shape index: {}]   ;;  %s1171_s2 = inlined_call_operand.vmem [shape: f32[1,16], index: 2, kind: input, shape index: {}]   ;;  %s1172_s3 = inlined_call_operand.vmem [shape: f32[8,16], index: 3, kind: input, shape index: {}]   ;;  %s1173_s4 = inlined_call_operand.<no memory space> [shape: f32[1,1], index: 4, kind: input, shape index: {}]   ;;  %s1174_s5 = inlined_call_operand.hbm [shape: f32[1,256], index: 5, kind: output, shape index: {}]  }
   0x1   :  { %10 = sst [smem:[#allocation2]] %s1173_s4 }
   0x2   :  { %11 = vsyncpa [#allocation4], 0 }
   0x3   :  { %13 = vsyncpa [#allocation4 + $0x1], 0  ;;  %s981_s20 = smov 0   ;;  %s983_s21 = smov 0  }
   0x4   :  { %s985_s22 = smov 0   ;;  %s987_s23 = smov 0  }
   0x5 LB: > { %s690_s4 = sadd.s32 4294967295, %s943_s23   ;;  %s691_s24 = sadd.s32 4294967294, %s943_s23   ;;  %s943_s23 = sphi %s987_s23, %s1180_s23   ;;  %s939_s22 = sphi %s985_s22, %s1179_s22   ;;  %s935_s21 = sphi %s983_s21, %s1178_s21   ;;  %s931_s20 = sphi %s981_s20, %s1177_s20  }
   0x6   : > { %s1004_s25 = sadd.s32 1, %s943_s23   ;;  %s136_s26 = sadd.s32 1, %s939_s22 }
   0x7   : > { %s133_s27 = ssub.s32 %s943_s23, %s1004_s25  ;;  %p146_p0 = scmp.ne.s32.totalorder %s939_s22, %s935_s21 }
   0x8   : > { %p134_p1 = scmp.eq.s32.totalorder %s133_s27, 0  ;;  %p147_p2 = scmp.eq.s32.totalorder %s690_s4, 1 }
   0x9   : > { %p152_p3 = scmp.ne.s32.totalorder %s935_s21, %s931_s20  ;;  %p153_p4 = scmp.eq.s32.totalorder %s691_s24, 1 }
   0xa   : > { %s1014_s28 = scalar_select %p134_p1, %s939_s22, %s136_s26  }
   0xb   : > { %p1016_p5 = por %p147_p2, %p146_p0  ;;  %p1020_p6 = por %p153_p4, %p152_p3 }
   0xc   : > { %p694_p7 = scmp.ge.s32.totalorder %s943_s23, 1  ;;  %p192_p8 = scmp.lt.s32.totalorder %s943_s23, 3 }
   0xe   : > { %p193_p9 = pnand %p694_p7, %p192_p8 }
   0xf   : > { %s1029_s8 = sshll.u32 (!%p193_p9), %s690_s4, 4  ;;  %s614_s6 = sld [smem:[#allocation2]] (!%p193_p9) }
  0x10   : > { %196 = sbr.rel (%p193_p9) target bundleno = 569 (0x239), region = 40  ;;  %p220_p10 = scmp.lt.s32.totalorder (!%p193_p9), %s1029_s8, 31 }
  0x11   : > { %s217_s7 = sand.u32 (!%p193_p9), 1, %s935_s21   ;;  %s1134_s13 = scalar_lea.hbm (!%p193_p9), %s1174_s5, %s1029_s8 }
  0x12   : > { %s218_s9 = scalar_lea.vmem (!%p193_p9), [#allocation3], %s217_s7  ;;  %s947_s16 = smov (!%p193_p9), [#allocation3]  }
  0x13   : > { %s636_s10 = sshll.u32 (!%p193_p9), %s218_s9, 4  ;;  %s637_s10 = int_to_ptr.vmem [resolvable:$true] %s636_s10 }
  0x14   : > { %s883_s15 = scalar_lea.vmem (!%p193_p9), %s637_s10, 16 }
  0x15   : > { %v867_v0 = vld [vmem:[%s1170_s1 + $0x18] sm:$0xff]   ;;  %v868_v1 = vld [vmem:[%s1170_s1 + $0x10] sm:$0xff]   ;;  %s221_s11 = scalar_select %p220_p10, %s1029_s8, 31  ;;  %v869_v2 = vld [vmem:[%s1170_s1 + $0x8] sm:$0xff]   ;;  %vm321_vm0 = vcmask 523264   ;;  %v945_v12 = vmov 0.0  }
  0x16   : > { %767 = vmatprep.subr.bf16.mxu0 %v867_v0  ;;  %v870_v4 = vld [vmem:[%s1170_s1] sm:$0xff]   ;;  %791 = vmatprep.subr.mxu1 %v945_v12  ;;  %vm946_vm1 = vmmov 0   ;;  %vm492_vm3 = vcmask 130048   ;;  %p884_p11 = scmp.ne.s32.totalorder %s637_s10, %s883_s15 }
  0x17   : > { %768 = vmatpush3.bf16.msra.mxu0 %v867_v0  ;;  %s696_s14 = sshll.u32 %s221_s11, 2  ;;  %823 = vmatprep.mubr.msk.f32.mxu1 %vm946_vm1, %v945_v12  ;;  %v1070_v27 = vld [vmem:[%s1171_s2] ss:$0 sm:$0xff] }
  0x18   : > { %769 = vmatprep.subr.bf16.mxu0 %v868_v1  ;;  %s223_s17 = scalar_lea.vmem %s1169_s0, %s696_s14  ;;  %s624_s14 = scalar_lea.sflag [#allocation4], %s217_s7 }
  0x19   : > { %v871_v3 = vld [vmem:[%s223_s17] sm:$0xff]   ;;  %v872_v5 = vld [vmem:[%s223_s17 + $0x8] sm:$0xff]   ;;  %v873_v6 = vld [vmem:[%s223_s17 + $0x10] sm:$0xff]   ;;  %p885_p12 = pnand %p884_p11, %p1016_p5 }
  0x1a   : > { %775 = vmatprep.mubr.msk.bf16.mxu0 %vm321_vm0, %v871_v3  ;;  %v874_v7 = vld [vmem:[%s223_s17 + $0x18] sm:$0xff]   ;;  %v875_v8 = vld [vmem:[%s223_s17 + $0x20] sm:$0xff]   ;;  %v876_v9 = vld [vmem:[%s223_s17 + $0x28] sm:$0xff]  }
  0x1b   : > { %770 = vmatpush3.bf16.msra.mxu0 %v868_v1  ;;  %v877_v10 = vld [vmem:[%s223_s17 + $0x30] sm:$0xff]   ;;  %v878_v11 = vld [vmem:[%s223_s17 + $0x38] sm:$0xff]   ;;  %p886_p13 = pneg %p885_p12  ;;  %s887_s17 = sshll.u32 %s947_s16, 4  ;;  %s888_s17 = int_to_ptr.vmem [resolvable:$false] %s887_s17 }
  0x1c   : > { %771 = vmatprep.subr.bf16.mxu0 %v869_v2  ;;  %s889_s18 = scalar_lea.vmem %s888_s17, 32  ;;  %p890_p0 = scmp.lt.s32.totalorder %s637_s10, %s888_s17 }
  0x1d   : > { %p891_p1 = scmp.lt.s32.totalorder %s889_s18, %s883_s15 }
  0x1f   : > { %772 = vmatpush3.bf16.msra.mxu0 %v869_v2  ;;  %p892_p2 = por %p891_p1, %p890_p0 }
  0x20   : > { %773 = vmatprep.subr.bf16.mxu0 %v870_v4 }
  0x21   : > { %p893_p3 = pnand %p892_p2, %p886_p13 }
  0x23   : > { %774 = vmatpush3.bf16.msra.mxu0 %v870_v4 }
  0x26   : > { %776 = vmatmul.mubr.msk.bf16.vlgmr.msra.gmra.mxu0 %vm321_vm0, %v872_v5 }
  0x27   : > { %779 = vmatprep.mubr.msk.bf16.mxu0 %vm321_vm0, %v873_v6 }
  0x2e   : > { %780 = vmatmul.mubr.msk.bf16.gmra.mxu0 %vm321_vm0, %v874_v7 }
  0x2f   : > { %783 = vmatprep.mubr.msk.bf16.mxu0 %vm321_vm0, %v875_v8 }
  0x36   : > { %784 = vmatmul.mubr.msk.bf16.gmra.mxu0 %vm321_vm0, %v876_v9 }
  0x37   : > { %787 = vmatprep.mubr.msk.bf16.mxu0 %vm321_vm0, %v877_v10 }
  0x3e   : > { %788 = vmatmul.mubr.msk.bf16.gmra.mxu0 %vm321_vm0, %v878_v11 }
  0xe6   : > { %v1055_v13 = vpop.f32.mrf.mxu0 }
  0xe7   : > { %v389_v2 = vadd.f32 %v1055_v13, %v1070_v27 }
  0xe8   : > { %v1057_v14 = vpop.f32.mrf.mxu0 }
  0xe9   : > { %v461_v5 = vmul.f32 0.2, %v389_v2  ;;  %vm445_vm0 = vcmp.gt.f32.partialorder %v389_v2, 0.0  ;;  %v381_v8 = vadd.f32 %v1070_v27, %v1057_v14  ;;  %v491_v14 = vld [vmem:[%s1172_s3] sm:$0xff] }
  0xea   : > { %v1059_v15 = vpop.f32.mrf.mxu0 }
  0xeb   : > { %v392_v63 = vadd.f32 %v1059_v15, %v1070_v27  ;;  %v477_v10 = vsel %vm445_vm0, %v389_v2, %v461_v5  ;;  %v459_v11 = vmul.f32 0.2, %v381_v8 }
  0xec   : > { %v1061_v16 = vpop.f32.mrf.mxu0 }
  0xed   : > { %v462_v3 = vmul.f32 0.2, %v392_v63  ;;  %vm446_vm15 = vcmp.gt.f32.partialorder %v392_v63, 0.0  ;;  %v384_v6 = vadd.f32 %v1070_v27, %v1061_v16  ;;  %v615_v16 = vstv %s614_s6 }
  0xee   : > { %v781_v17 = vpop.f32.mrf.mxu0 }
  0xef   : > { %v405_v54 = vadd.f32 %v781_v17, %v1070_v27  ;;  %v478_v7 = vsel %vm446_vm15, %v392_v63, %v462_v3  ;;  %v460_v9 = vmul.f32 0.2, %v384_v6  ;;  %vm444_vm1 = vcmp.gt.f32.partialorder %v384_v6, 0.0 }
  0xf0   : > { %v1063_v18 = vpop.f32.mrf.mxu0 }
  0xf1   : > { %v465_v57 = vmul.f32 0.2, %v405_v54  ;;  %vm449_vm12 = vcmp.gt.f32.partialorder %v405_v54, 0.0  ;;  %v397_v60 = vadd.f32 %v1070_v27, %v1063_v18  ;;  %v476_v13 = vsel %vm444_vm1, %v384_v6, %v460_v9 }
  0xf2   : > { %v782_v19 = vpop.f32.mrf.mxu0 }
  0xf3   : > { %v408_v51 = vadd.f32 %v782_v19, %v1070_v27  ;;  %v481_v62 = vsel %vm449_vm12, %v405_v54, %v465_v57  ;;  %v463_v0 = vmul.f32 0.2, %v397_v60  ;;  %vm447_vm14 = vcmp.gt.f32.partialorder %v397_v60, 0.0 }
  0xf4   : > { %v1065_v20 = vpop.f32.mrf.mxu0 }
  0xf5   : > { %v466_v55 = vmul.f32 0.2, %v408_v51  ;;  %vm450_vm11 = vcmp.gt.f32.partialorder %v408_v51, 0.0  ;;  %v400_v58 = vadd.f32 %v1070_v27, %v1065_v20  ;;  %v479_v4 = vsel %vm447_vm14, %v397_v60, %v463_v0 }
  0xf6   : > { %v785_v21 = vpop.f32.mrf.mxu0 }
  0xf7   : > { %v421_v42 = vadd.f32 %v785_v21, %v1070_v27  ;;  %v482_v59 = vsel %vm450_vm11, %v408_v51, %v466_v55  ;;  %v464_v61 = vmul.f32 0.2, %v400_v58  ;;  %vm448_vm13 = vcmp.gt.f32.partialorder %v400_v58, 0.0 }
  0xf8   : > { %v412_v22 = vpop.f32.mrf.mxu0 }
  0xf9   : > { %v469_v45 = vmul.f32 0.2, %v421_v42  ;;  %vm453_vm8 = vcmp.gt.f32.partialorder %v421_v42, 0.0  ;;  %v413_v48 = vadd.f32 %v1070_v27, %v412_v22  ;;  %v480_v1 = vsel %vm448_vm13, %v400_v58, %v464_v61 }
  0xfa   : > { %v786_v23 = vpop.f32.mrf.mxu0 }
  0xfb   : > { %v424_v39 = vadd.f32 %v786_v23, %v1070_v27  ;;  %v485_v50 = vsel %vm453_vm8, %v421_v42, %v469_v45  ;;  %v467_v52 = vmul.f32 0.2, %v413_v48  ;;  %vm451_vm10 = vcmp.gt.f32.partialorder %v413_v48, 0.0 }
  0xfc   : > { %v415_v24 = vpop.f32.mrf.mxu0 }
  0xfd   : > { %v470_v43 = vmul.f32 0.2, %v424_v39  ;;  %vm454_vm7 = vcmp.gt.f32.partialorder %v424_v39, 0.0  ;;  %v416_v46 = vadd.f32 %v1070_v27, %v415_v24  ;;  %v483_v56 = vsel %vm451_vm10, %v413_v48, %v467_v52 }
  0xfe   : > { %v789_v25 = vpop.f32.mrf.mxu0 }
  0xff   : > { %v437_v29 = vadd.f32 %v789_v25, %v1070_v27  ;;  %v486_v47 = vsel %vm454_vm7, %v424_v39, %v470_v43  ;;  %v468_v49 = vmul.f32 0.2, %v416_v46  ;;  %vm452_vm9 = vcmp.gt.f32.partialorder %v416_v46, 0.0 }
 0x100   : > { %v428_v26 = vpop.f32.mrf.mxu0 }
 0x101   : > { %v473_v33 = vmul.f32 0.2, %v437_v29  ;;  %vm457_vm4 = vcmp.gt.f32.partialorder %v437_v29, 0.0  ;;  %v429_v36 = vadd.f32 %v1070_v27, %v428_v26  ;;  %v484_v53 = vsel %vm452_vm9, %v416_v46, %v468_v49 }
 0x102   : > { %v790_v28 = vpop.f32.mrf.mxu0 }
 0x103   : > { %v440_v30 = vadd.f32 %v790_v28, %v1070_v27  ;;  %v489_v38 = vsel %vm457_vm4, %v437_v29, %v473_v33  ;;  %v471_v40 = vmul.f32 0.2, %v429_v36  ;;  %vm455_vm6 = vcmp.gt.f32.partialorder %v429_v36, 0.0 }
 0x104   : > { %v431_v31 = vpop.f32.mrf.mxu0 }
 0x105   : > { %v474_v32 = vmul.f32 0.2, %v440_v30  ;;  %vm458_vm2 = vcmp.gt.f32.partialorder %v440_v30, 0.0  ;;  %v432_v34 = vadd.f32 %v1070_v27, %v431_v31  ;;  %v487_v44 = vsel %vm455_vm6, %v429_v36, %v471_v40 }
 0x107   : > { %v490_v35 = vsel %vm458_vm2, %v440_v30, %v474_v32  ;;  %v472_v37 = vmul.f32 0.2, %v432_v34  ;;  %vm456_vm5 = vcmp.gt.f32.partialorder %v432_v34, 0.0  ;;  %vm443_vm2 = vcmp.gt.f32.partialorder %v381_v8, 0.0 }
 0x108   : > { %792 = vmatpush3.xpose.msk.msra.mxu1 %vm492_vm3, %v490_v35  ;;  %v475_v15 = vsel %vm443_vm2, %v381_v8, %v459_v11 }
 0x109   : > { %793 = vmatprep.subr.mxu1 %v945_v12  ;;  %v488_v41 = vsel %vm456_vm5, %v432_v34, %v472_v37 }
 0x10c   : > { %794 = vmatpush3.xpose.msk.msra.mxu1 %vm492_vm3, %v489_v38 }
 0x10d   : > { %795 = vmatprep.subr.mxu1 %v945_v12 }
 0x110   : > { %796 = vmatpush3.xpose.msk.msra.mxu1 %vm492_vm3, %v488_v41 }
 0x111   : > { %797 = vmatprep.subr.mxu1 %v945_v12 }
 0x114   : > { %798 = vmatpush3.xpose.msk.msra.mxu1 %vm492_vm3, %v487_v44 }
 0x115   : > { %799 = vmatprep.subr.mxu1 %v945_v12 }
 0x118   : > { %800 = vmatpush3.xpose.msk.msra.mxu1 %vm492_vm3, %v486_v47 }
 0x119   : > { %801 = vmatprep.subr.mxu1 %v945_v12 }
 0x11c   : > { %802 = vmatpush3.xpose.msk.msra.mxu1 %vm492_vm3, %v485_v50 }
 0x11d   : > { %803 = vmatprep.subr.mxu1 %v945_v12 }
 0x120   : > { %804 = vmatpush3.xpose.msk.msra.mxu1 %vm492_vm3, %v484_v53 }
 0x121   : > { %805 = vmatprep.subr.mxu1 %v945_v12 }
 0x124   : > { %806 = vmatpush3.xpose.msk.msra.mxu1 %vm492_vm3, %v483_v56 }
 0x125   : > { %807 = vmatprep.subr.mxu1 %v945_v12 }
 0x128   : > { %808 = vmatpush3.xpose.msk.msra.mxu1 %vm492_vm3, %v482_v59 }
 0x129   : > { %809 = vmatprep.subr.mxu1 %v945_v12 }
 0x12c   : > { %810 = vmatpush3.xpose.msk.msra.mxu1 %vm492_vm3, %v481_v62 }
 0x12d   : > { %811 = vmatprep.subr.mxu1 %v945_v12 }
 0x130   : > { %812 = vmatpush3.xpose.msk.msra.mxu1 %vm492_vm3, %v480_v1 }
 0x131   : > { %813 = vmatprep.subr.mxu1 %v945_v12 }
 0x134   : > { %814 = vmatpush3.xpose.msk.msra.mxu1 %vm492_vm3, %v479_v4 }
 0x135   : > { %815 = vmatprep.subr.mxu1 %v945_v12 }
 0x138   : > { %816 = vmatpush3.xpose.msk.msra.mxu1 %vm492_vm3, %v478_v7 }
 0x139   : > { %817 = vmatprep.subr.mxu1 %v945_v12 }
 0x13c   : > { %818 = vmatpush3.xpose.msk.msra.mxu1 %vm492_vm3, %v477_v10 }
 0x13d   : > { %819 = vmatprep.subr.mxu1 %v945_v12 }
 0x140   : > { %820 = vmatpush3.xpose.msk.msra.mxu1 %vm492_vm3, %v476_v13 }
 0x141   : > { %821 = vmatprep.subr.mxu1 %v945_v12 }
 0x144   : > { %822 = vmatpush3.xpose.msk.msra.mxu1 %vm492_vm3, %v475_v15 }
 0x147   : > { %824 = vmatmul.mubr.msk.f32.vlgmr.msra.gmra.mxu1 %vm492_vm3, %v491_v14 }
 0x207   : > { %v610_v17 = vpop.f32.mrf.mxu1 }
 0x208   : > { %v616_v18 = vadd.f32 %v615_v16, %v610_v17 }
 0x209   : > { %v825_v19 = vpop.f32.mrf.mxu1 }
 0x20a   : > { %v617_v20 = vsub.f32 0.0, %v616_v18 }
 0x20c   : > { %v618_v21 = vmul.f32 1.442695, %v617_v20 }
 0x20e   : > { %879 = vpow2.f32 %v618_v21 }
 0x21b   : > { %v880_v12 = vpop.eup %879 }
 0x21c   : > { %v620_v22 = vadd.f32 1.0, %v880_v12 }
 0x21e   : > { %881 = vrcp.f32 %v620_v22 }
 0x22b   : > { %v882_v23 = vpop.eup %881 }
 0x22c   : > { %622 = vst [vmem:[%s218_s9] sm:$0x1] %v882_v23 }
 0x22d   : > { %896 = shalt.err (!%p893_p3)
}
 0x22e   : > { %s897_s8 = scalar_lea.hbm %s1134_s13, 16  ;;  %s901_s24 = scalar_lea.hbm %s1174_s5, 32 }
 0x22f   : > { %p898_p4 = scmp.ne.s32.totalorder %s1134_s13, %s897_s8  ;;  %p902_p9 = scmp.lt.s32.totalorder %s1134_s13, %s1174_s5 }
 0x230   : > { %p903_p10 = scmp.lt.s32.totalorder %s901_s24, %s897_s8 }
 0x231   : > { %p899_p7 = pnand %p898_p4, %p1016_p5 }
 0x232   : > { %p904_p11 = por %p903_p10, %p902_p9 }
 0x233   : > { %p900_p8 = pneg %p899_p7 }
 0x235   : > { %p905_p12 = pnand %p904_p11, %p900_p8 }
 0x237   : > { %908 = shalt.err (!%p905_p12)
}
 0x238   : > { %826 = dma.vmem_to_hbm [thread:$0]  (%p1016_p5), %s637_s10, 16, %s1134_s13, %s624_s14  }
 0x239 PF: > { %p832_p13 = scmp.ge.s32.totalorder %s943_s23, 2  ;;  %s648_s6 = sand.u32 1, %s931_s20  }
 0x23a   : > { %s649_s7 = scalar_lea.sflag [#allocation4], %s648_s6 }
 0x23b   : > { %p829_p0 = pnand %p832_p13, %p1020_p6 }
 0x23d   : > { %p830_p1 = pneg %p829_p0 }
 0x23f   : > { %926 = dma.done.wait (%p830_p1), %s649_s7, 16  }
 0x240   : > { %928 = vsyncadd (%p830_p1), %s649_s7, 4294967280  ;;  %p16_p2 = scmp.ge.s32.totalorder %s1004_s25, 4   ;;  %s1177_s20 = smov %s935_s21 }
 0x241   : > { %s1178_s21 = smov %s939_s22  ;;  %s1179_s22 = smov %s1014_s28 }
 0x242   : > { %s1180_s23 = smov %s1004_s25  ;;  %18 = sbr.rel (!%p16_p2) target bundleno = 5 (0x5), region = 75 }
 0x247   :  { %653 = vsyncpa [#allocation4], 1 }
 0x248   :  { %655 = vsyncpa [#allocation4 + $0x1], 1 }

</bundles_post_ra>
